<compile_context>
chip_gen: v5e
topology: v5e:2x2
jax: 0.10.0
libtpu: 0.0.40
codegen_flags: <defaults>
</compile_context>

<pallas_src>
import functools
import numpy as np
import jax
import jax.numpy as jnp
from jax.experimental import pallas as pl
from jax.experimental.pallas import tpu as pltpu


def _columnwise_allsum(x, *, stride, count):
    """x has last dim of size count*stride.  Returns a same-shaped array where
    every position j holds sum_{t<count} x[..., (j + t*stride) % (count*stride)],
    i.e. the sum over the `count` positions sharing j's residue mod `stride`,
    broadcast back onto each of them.  O(log count) XLU lane rotations, no
    relayout.  The rotation direction of pltpu.roll is irrelevant because the
    cyclic offsets cover each column element exactly once either way."""
    axis = x.ndim - 1
    total = None
    partial = x            # covers `blk` stride-spaced offsets
    blk, done, n = 1, 0, count
    while True:
        if n & 1:
            contrib = partial if done == 0 else pltpu.roll(
                partial, shift=done * stride, axis=axis)
            total = contrib if total is None else total + contrib
            done += blk
        n >>= 1
        if n == 0:
            break
        partial = partial + pltpu.roll(partial, shift=blk * stride, axis=axis)
        blk *= 2
    return total


def _attention_kernel(x_ref, phi_ref, tw_ref, psw_ref, psb_ref, y_ref, attn_ref,
                      *, H, W, bt):
    """One grid step = `bt` batches, each as a channels-on-sublane (C, H*W) slab."""
    tw = tw_ref[...]                                    # (Ci, Cin)
    psw = psw_ref[...].astype(jnp.float32)              # (Ci, 1)
    psb = psb_ref[0]                                    # psi bias scalar (SMEM)

    def per_batch(b, carry):
        xb = x_ref[b]                                   # (Cin, HW)
        # theta(x): 1x1 conv == (Ci,Cin) @ (Cin,HW) on the MXU, f32 accumulate.
        theta = jnp.dot(tw, xb, preferred_element_type=jnp.float32)      # (Ci,HW)
        f = jnp.maximum(theta + phi_ref[b].astype(jnp.float32), 0.0)     # relu
        # psi: inter->1 conv with bias; Ci sits on sublanes -> cheap reduce.
        psi = jnp.sum(f * psw, axis=0, keepdims=True) + psb              # (1,HW)
        # F.normalize(psi_f, dim=2): L2 over H for every (b, w) column,
        # broadcast back to every (h, w) lane via the roll tree.
        sumsq = _columnwise_allsum(psi * psi, stride=W, count=H)         # (1,HW)
        inv = jax.lax.rsqrt(jnp.maximum(sumsq, 1e-24))  # == 1/max(||.||, 1e-12)
        attn = psi * inv                                                 # (1,HW)
        # y = attn.expand_as(x) * x  (W is identity, use_W=False).
        y_ref[b] = (xb.astype(jnp.float32) * attn).astype(y_ref.dtype)
        attn_ref[b] = attn.astype(attn_ref.dtype)
        return carry

    jax.lax.fori_loop(0, bt, per_batch, 0, unroll=bt <= 4)


def _bilinear_upsample_nchw(g, H, W):
    """PyTorch F.upsample(mode='bilinear', align_corners=False) semantics."""
    B, C, Hg, Wg = g.shape
    if (Hg, Wg) == (H, W):
        return g

    def src(out_size, in_size):
        scale = in_size / out_size
        s = (jnp.arange(out_size, dtype=jnp.float32) + 0.5) * scale - 0.5
        s = jnp.maximum(s, 0.0)
        i0 = jnp.minimum(jnp.floor(s).astype(jnp.int32), in_size - 1)
        i1 = jnp.minimum(i0 + 1, in_size - 1)
        frac = s - i0.astype(jnp.float32)
        return i0, i1, frac

    h0, h1, fh = src(H, Hg)
    w0, w1, fw = src(W, Wg)
    gh = (g[:, :, h0, :] * (1.0 - fh)[None, None, :, None]
          + g[:, :, h1, :] * fh[None, None, :, None])
    out = (gh[:, :, :, w0] * (1.0 - fw)[None, None, None, :]
           + gh[:, :, :, w1] * fw[None, None, None, :])
    return out


def _pick_batch_block(B, per_batch_bytes, target_bytes=1 << 20):
    """Largest divisor of B whose block stays under ~1 MiB while keeping at
    least 2 grid steps when B allows (so both v7x TensorCores get work)."""
    bt = 1
    for d in range(1, B + 1):
        if B % d == 0 and d * per_batch_bytes <= target_bytes and (B // d >= 2 or d == 1):
            bt = d
    return bt


def grid_attention_forward(x_nchw, g_nchw, theta_w, phi_w, psi_w, psi_b,
                           *, use_bf16_inputs=False, batch_block=None):
    """Returns (W_y, sigm_psi_f) exactly as the PyTorch module (NCHW layout).
    Weights are the squeezed 1x1-conv params: theta_w (Ci,Cin), phi_w (Ci,Cg),
    psi_w (Ci,), psi_b (1,)."""
    B, Cin, H, W = x_nchw.shape
    Bg, Cg, Hg, Wg = g_nchw.shape
    assert B == Bg
    Ci = theta_w.shape[0]
    HW = H * W

    # --- XLA glue: phi 1x1 conv at (Hg,Wg), THEN bilinear upsample of the
    # Ci-channel result (exactly the PyTorch op order; kernel ingests Ci, not Cg).
    phi_low = jnp.einsum('bchw,ic->bihw', g_nchw.astype(jnp.float32),
                         phi_w.astype(jnp.float32))
    phi_up = _bilinear_upsample_nchw(phi_low, H, W)               # (B, Ci, H, W)

    # Channels-on-sublane, flat-spatial-on-lane slabs (contiguous reshapes).
    act_dtype = jnp.bfloat16 if use_bf16_inputs else jnp.float32
    x_t = x_nchw.reshape(B, Cin, HW).astype(act_dtype)
    phi_t = phi_up.reshape(B, Ci, HW).astype(act_dtype)
    tw = theta_w.astype(act_dtype)                                # (Ci, Cin)
    psw = psi_w.reshape(Ci, 1).astype(act_dtype)                  # (Ci, 1)
    psb = psi_b.astype(jnp.float32).reshape(1)                    # SMEM scalar

    act_bytes = 2 if use_bf16_inputs else 4
    per_batch_bytes = HW * (act_bytes * (Cin + Ci) + 4 * (Cin + 1))
    bt = batch_block if batch_block is not None else _pick_batch_block(B, per_batch_bytes)
    assert B % bt == 0
    grid = (B // bt,)
    vmem_limit = int(min(max(6 * bt * per_batch_bytes + (1 << 20), 16 << 20), 48 << 20))

    kernel = functools.partial(_attention_kernel, H=H, W=W, bt=bt)
    y_t, attn_t = pl.pallas_call(
        kernel,
        out_shape=(jax.ShapeDtypeStruct((B, Cin, HW), jnp.float32),
                   jax.ShapeDtypeStruct((B, 1, HW), jnp.float32)),
        grid=grid,
        in_specs=[
            pl.BlockSpec((bt, Cin, HW), lambda i: (i, 0, 0)),     # x slabs
            pl.BlockSpec((bt, Ci, HW), lambda i: (i, 0, 0)),      # phi_g slabs
            pl.BlockSpec((Ci, Cin), lambda i: (0, 0)),            # theta weight
            pl.BlockSpec((Ci, 1), lambda i: (0, 0)),              # psi weight
            pl.BlockSpec(memory_space=pltpu.MemorySpace.SMEM),    # psi bias
        ],
        out_specs=(pl.BlockSpec((bt, Cin, HW), lambda i: (i, 0, 0)),
                   pl.BlockSpec((bt, 1, HW), lambda i: (i, 0, 0))),
        compiler_params=pltpu.CompilerParams(
            dimension_semantics=("parallel",),
            vmem_limit_bytes=vmem_limit),
    )(x_t, phi_t, tw, psw, psb)

    W_y = y_t.reshape(B, Cin, H, W)            # use_W=False -> identity W
    sigm_psi_f = attn_t.reshape(B, 1, H, W)
    return W_y, sigm_psi_f


def _reference_forward(x, g, theta_w, phi_w, psi_w, psi_b):
    """Pure-JAX reference following the PyTorch op order."""
    B, Cin, H, W = x.shape
    theta_x = jnp.einsum('bchw,ic->bihw', x, theta_w)
    phi_g = _bilinear_upsample_nchw(jnp.einsum('bchw,ic->bihw', g, phi_w), H, W)
    f = jnp.maximum(theta_x + phi_g, 0.0)
    psi = jnp.einsum('bihw,i->bhw', f, psi_w)[:, None, :, :] + psi_b[0]
    denom = jnp.maximum(jnp.sqrt(jnp.sum(psi * psi, axis=2, keepdims=True)), 1e-12)
    attn = psi / denom                         # F.normalize(psi_f, dim=2)
    return attn * x, attn


if __name__ == "__main__":
    B = 2
    in_channels = 8
    gating_channels = 8
    inter_channels = in_channels // 2          # module default (= 4)
    H, W = 16, 16
    Hg, Wg = 8, 8

    key = jax.random.PRNGKey(0)
    kx, kg, kt, kp, ks = jax.random.split(key, 5)

    x = jax.random.normal(kx, (B, in_channels, H, W), dtype=jnp.float32)
    g = jax.random.normal(kg, (B, gating_channels, Hg, Wg), dtype=jnp.float32)

    theta_w = 0.1 * jax.random.normal(kt, (inter_channels, in_channels), dtype=jnp.float32)
    phi_w = 0.1 * jax.random.normal(kp, (inter_channels, gating_channels), dtype=jnp.float32)
    psi_w = 0.1 * jax.random.normal(ks, (inter_channels,), dtype=jnp.float32)
    psi_b = jnp.array([10.0], dtype=jnp.float32)   # nn.init.constant_(psi.bias, 10.0)

    W_y, sigm_psi_f = grid_attention_forward(x, g, theta_w, phi_w, psi_w, psi_b)
    jax.block_until_ready((W_y, sigm_psi_f))

    y_ref, attn_ref = _reference_forward(x, g, theta_w, phi_w, psi_w, psi_b)
    np.testing.assert_allclose(np.asarray(W_y), np.asarray(y_ref), rtol=1e-4, atol=1e-4)
    np.testing.assert_allclose(np.asarray(sigm_psi_f), np.asarray(attn_ref), rtol=1e-4, atol=1e-4)

    assert W_y.shape == (B, in_channels, H, W)
    assert sigm_psi_f.shape == (B, 1, H, W)
    print("KERNEL_OK")
</pallas_src>

<mosaic_0001>
module attributes {stable_mosaic.version = 11 : i64} {
  func.func @_attention_kernel(%arg0: i32, %arg1: memref<1x8x256xf32, #tpu.memory_space<vmem>>, %arg2: memref<1x4x256xf32, #tpu.memory_space<vmem>>, %arg3: memref<4x8xf32, #tpu.memory_space<vmem>>, %arg4: memref<4x1xf32, #tpu.memory_space<vmem>>, %arg5: memref<1xf32, #tpu.memory_space<smem>>, %arg6: memref<1x8x256xf32, #tpu.memory_space<vmem>>, %arg7: memref<1x1x256xf32, #tpu.memory_space<vmem>>) attributes {dimension_semantics = [#tpu.dimension_semantics<parallel>], iteration_bounds = array<i64: 2>, scalar_prefetch = 0 : i64, scratch_operands = 0 : i64, tpu.core_type = #tpu.core_type<tc>, window_params = [{transform_indices = @transform_0, window_bounds = array<i64: 1, 8, 256>}, {transform_indices = @transform_1, window_bounds = array<i64: 1, 4, 256>}, {pipeline_mode = #tpu.pipeline_mode<synchronous>, transform_indices = @transform_2, window_bounds = array<i64: 4, 8>}, {pipeline_mode = #tpu.pipeline_mode<synchronous>, transform_indices = @transform_3, window_bounds = array<i64: 4, 1>}, {transform_indices = @transform_4, window_bounds = array<i64: 1>}, {transform_indices = @transform_5, window_bounds = array<i64: 1, 8, 256>}, {transform_indices = @transform_6, window_bounds = array<i64: 1, 1, 256>}]} {
    %c0 = arith.constant 0 : index
    %c0_0 = arith.constant 0 : index
    %0 = vector.load %arg3[%c0, %c0_0] : memref<4x8xf32, #tpu.memory_space<vmem>>, vector<4x8xf32>
    %c0_1 = arith.constant 0 : index
    %c0_2 = arith.constant 0 : index
    %1 = vector.load %arg4[%c0_1, %c0_2] : memref<4x1xf32, #tpu.memory_space<vmem>>, vector<4x1xf32>
    %c0_3 = arith.constant 0 : index
    %2 = memref.load %arg5[%c0_3] : memref<1xf32, #tpu.memory_space<smem>>
    %c0_i32 = arith.constant 0 : i32
    %3 = arith.index_cast %c0_i32 : i32 to index
    %c0_4 = arith.constant 0 : index
    %c0_5 = arith.constant 0 : index
    %4 = vector.load %arg1[%3, %c0_4, %c0_5] : memref<1x8x256xf32, #tpu.memory_space<vmem>>, vector<1x8x256xf32>
    %5 = vector.shape_cast %4 : vector<1x8x256xf32> to vector<8x256xf32>
    %cst = arith.constant dense<0.000000e+00> : vector<4x256xf32>
    %6 = tpu.matmul %0, %5, %cst {dimension_numbers = #tpu.dot_dimension_numbers<[1], [0], [0], [1], [0, 0, 1, 1], [], []>} : vector<4x8xf32>, vector<8x256xf32>, vector<4x256xf32> -> vector<4x256xf32>
    %7 = arith.index_cast %c0_i32 : i32 to index
    %c0_6 = arith.constant 0 : index
    %c0_7 = arith.constant 0 : index
    %8 = vector.load %arg2[%7, %c0_6, %c0_7] : memref<1x4x256xf32, #tpu.memory_space<vmem>>, vector<1x4x256xf32>
    %9 = vector.shape_cast %8 : vector<1x4x256xf32> to vector<4x256xf32>
    %10 = arith.addf %6, %9 : vector<4x256xf32>
    %cst_8 = arith.constant 0.000000e+00 : f32
    %11 = vector.broadcast %cst_8 : f32 to vector<4x256xf32>
    %12 = arith.maximumf %10, %11 : vector<4x256xf32>
    %13 = vector.broadcast %1 : vector<4x1xf32> to vector<4x256xf32>
    %14 = arith.mulf %12, %13 : vector<4x256xf32>
    %cst_9 = arith.constant dense<0.000000e+00> : vector<256xf32>
    %15 = vector.multi_reduction <add>, %14, %cst_9 [0] : vector<4x256xf32> to vector<256xf32>
    %16 = vector.shape_cast %15 : vector<256xf32> to vector<1x256xf32>
    %17 = vector.broadcast %2 : f32 to vector<1x256xf32>
    %18 = arith.addf %16, %17 : vector<1x256xf32>
    %19 = arith.mulf %18, %18 : vector<1x256xf32>
    %c16_i32 = arith.constant 16 : i32
    %20 = tpu.dynamic_rotate %19 by %c16_i32 dim 1 : vector<1x256xf32>, i32 -> vector<1x256xf32>
    %21 = arith.addf %19, %20 : vector<1x256xf32>
    %c32_i32 = arith.constant 32 : i32
    %22 = tpu.dynamic_rotate %21 by %c32_i32 dim 1 : vector<1x256xf32>, i32 -> vector<1x256xf32>
    %23 = arith.addf %21, %22 : vector<1x256xf32>
    %c64_i32 = arith.constant 64 : i32
    %24 = tpu.dynamic_rotate %23 by %c64_i32 dim 1 : vector<1x256xf32>, i32 -> vector<1x256xf32>
    %25 = arith.addf %23, %24 : vector<1x256xf32>
    %c128_i32 = arith.constant 128 : i32
    %26 = tpu.dynamic_rotate %25 by %c128_i32 dim 1 : vector<1x256xf32>, i32 -> vector<1x256xf32>
    %27 = arith.addf %25, %26 : vector<1x256xf32>
    %cst_10 = arith.constant 1.000000e-24 : f32
    %28 = vector.broadcast %cst_10 : f32 to vector<1x256xf32>
    %29 = arith.maximumf %27, %28 : vector<1x256xf32>
    %30 = math.rsqrt %29 : vector<1x256xf32>
    %31 = arith.mulf %18, %30 : vector<1x256xf32>
    %32 = vector.broadcast %31 : vector<1x256xf32> to vector<8x256xf32>
    %33 = arith.mulf %5, %32 : vector<8x256xf32>
    %34 = arith.index_cast %c0_i32 : i32 to index
    %c0_11 = arith.constant 0 : index
    %c0_12 = arith.constant 0 : index
    %35 = vector.load %arg6[%34, %c0_11, %c0_12] : memref<1x8x256xf32, #tpu.memory_space<vmem>>, vector<1x8x256xf32>
    %36 = vector.shape_cast %35 : vector<1x8x256xf32> to vector<8x256xf32>
    %37 = vector.shape_cast %33 : vector<8x256xf32> to vector<1x8x256xf32>
    tpu.vector_store %arg6[%34, %c0_11, %c0_12], %37 {strides = array<i32>} : memref<1x8x256xf32, #tpu.memory_space<vmem>>, vector<1x8x256xf32>,
    %38 = arith.index_cast %c0_i32 : i32 to index
    %c0_13 = arith.constant 0 : index
    %c0_14 = arith.constant 0 : index
    %39 = vector.load %arg7[%38, %c0_13, %c0_14] : memref<1x1x256xf32, #tpu.memory_space<vmem>>, vector<1x1x256xf32>
    %40 = vector.shape_cast %39 : vector<1x1x256xf32> to vector<1x256xf32>
    %41 = vector.shape_cast %31 : vector<1x256xf32> to vector<1x1x256xf32>
    tpu.vector_store %arg7[%38, %c0_13, %c0_14], %41 {strides = array<i32>} : memref<1x1x256xf32, #tpu.memory_space<vmem>>, vector<1x1x256xf32>,
    %c1_i32 = arith.constant 1 : i32
    return
  }
  func.func @transform_0(%arg0: i32) -> (i32, i32, i32) {
    %c0_i32 = arith.constant 0 : i32
    %c0_i32_0 = arith.constant 0 : i32
    %c0_i32_1 = arith.constant 0 : i32
    return %arg0, %c0_i32, %c0_i32_0 : i32, i32, i32
  }
  func.func @transform_1(%arg0: i32) -> (i32, i32, i32) {
    %c0_i32 = arith.constant 0 : i32
    %c0_i32_0 = arith.constant 0 : i32
    %c0_i32_1 = arith.constant 0 : i32
    return %arg0, %c0_i32, %c0_i32_0 : i32, i32, i32
  }
  func.func @transform_2(%arg0: i32) -> (i32, i32) {
    %c0_i32 = arith.constant 0 : i32
    %c0_i32_0 = arith.constant 0 : i32
    %c0_i32_1 = arith.constant 0 : i32
    return %c0_i32, %c0_i32_0 : i32, i32
  }
  func.func @transform_3(%arg0: i32) -> (i32, i32) {
    %c0_i32 = arith.constant 0 : i32
    %c0_i32_0 = arith.constant 0 : i32
    %c0_i32_1 = arith.constant 0 : i32
    return %c0_i32, %c0_i32_0 : i32, i32
  }
  func.func @transform_4(%arg0: i32) -> i32 {
    %c0_i32 = arith.constant 0 : i32
    %c0_i32_0 = arith.constant 0 : i32
    return %c0_i32 : i32
  }
  func.func @transform_5(%arg0: i32) -> (i32, i32, i32) {
    %c0_i32 = arith.constant 0 : i32
    %c0_i32_0 = arith.constant 0 : i32
    %c0_i32_1 = arith.constant 0 : i32
    return %arg0, %c0_i32, %c0_i32_0 : i32, i32, i32
  }
  func.func @transform_6(%arg0: i32) -> (i32, i32, i32) {
    %c0_i32 = arith.constant 0 : i32
    %c0_i32_0 = arith.constant 0 : i32
    %c0_i32_1 = arith.constant 0 : i32
    return %arg0, %c0_i32, %c0_i32_0 : i32, i32, i32
  }
}

</mosaic_0001>

<bundles_post_ra>
// kernel: tpu_custom_call.1
= control target key start
LH: loop header
LB: loop body
LE: loop exit
PB: predicated region body
PF: predicated region fallthrough
CT: control target
= control target key end

     0   :  { %s1133_s0 = inlined_call_operand.hbm [shape: f32[2,8,256], index: 0, kind: input, shape index: {}]   ;;  %s1134_s1 = inlined_call_operand.hbm [shape: f32[2,4,256], index: 1, kind: input, shape index: {}]   ;;  %s1135_s2 = inlined_call_operand.vmem [shape: f32[4,8], index: 2, kind: input, shape index: {}]   ;;  %s1136_s3 = inlined_call_operand.vmem [shape: f32[4,1], index: 3, kind: input, shape index: {}]   ;;  %s1137_s4 = inlined_call_operand.<no memory space> [shape: f32[1], index: 4, kind: input, shape index: {}]   ;;  %s1138_s5 = inlined_call_operand.hbm [shape: f32[2,8,256], index: 5, kind: output, shape index: {0}]   ;;  %s1139_s6 = inlined_call_operand.hbm [shape: f32[2,1,256], index: 6, kind: output, shape index: {1}]  }
   0x1   :  { %1140 = sst [smem:[#allocation16_spill]] %s1133_s0 }
   0x2   :  { %12 = sst [smem:[#allocation2]] %s1137_s4 }
   0x3   :  { %13 = vsyncpa [#allocation4], 0 }
   0x4   :  { %15 = vsyncpa [#allocation4 + $0x1], 0 }
   0x5   :  { %16 = vsyncpa [#allocation7], 0 }
   0x6   :  { %18 = vsyncpa [#allocation7 + $0x1], 0 }
   0x7   :  { %19 = vsyncpa [#allocation5], 0 }
   0x8   :  { %21 = vsyncpa [#allocation5 + $0x1], 0 }
   0x9   :  { %22 = vsyncpa [#allocation10], 0 }
   0xa   :  { %24 = vsyncpa [#allocation10 + $0x1], 0  ;;  %s924_s23 = smov 0   ;;  %s926_s24 = smov 0  }
   0xb   :  { %s928_s25 = smov 0   ;;  %s930_s26 = smov 0  }
   0xc LB: > { %s945_s4 = sadd.s32 4294967295, %s880_s26   ;;  %s629_s27 = sadd.s32 4294967294, %s880_s26   ;;  %s880_s26 = sphi %s930_s26, %s1154_s26   ;;  %s876_s25 = sphi %s928_s25, %s1153_s25   ;;  %s872_s24 = sphi %s926_s24, %s1152_s24   ;;  %s868_s23 = sphi %s924_s23, %s1151_s23  }
   0xd   : > { %s949_s28 = sadd.s32 1, %s880_s26   ;;  %s37_s29 = sadd.s32 1, %s876_s25 }
   0xe   : > { %s34_s30 = ssub.s32 %s880_s26, %s949_s28  ;;  %p44_p0 = scmp.ne.s32.totalorder %s876_s25, %s872_s24 }
   0xf   : > { %p35_p1 = scmp.eq.s32.totalorder %s34_s30, 0  ;;  %p45_p2 = scmp.eq.s32.totalorder %s880_s26, 0 }
  0x10   : > { %p50_p3 = scmp.ne.s32.totalorder %s872_s24, %s868_s23  ;;  %p51_p4 = scmp.eq.s32.totalorder %s945_s4, 0 }
  0x11   : > { %s961_s7 = scalar_select %p35_p1, %s876_s25, %s37_s29  }
  0x12   : > { %p963_p5 = por %p45_p2, %p44_p0  ;;  %p967_p6 = por %p51_p4, %p50_p3 }
  0x13   : > { %1141 = sst [smem:[#allocation15_spill]] %s961_s7  ;;  %p163_p7 = scmp.eq.s32.totalorder %s945_s4, 1 }
  0x14   : > { %p169_p8 = scmp.eq.s32.totalorder %s629_s27, 1  ;;  %p677_p10 = scmp.lt.s32.totalorder %s880_s26, 2 }
  0x15   : > { %p974_p11 = por %p163_p7, %p44_p0  ;;  %s983_s12 = sand.u32 1, %s876_s25  }
  0x16   : > { %p978_p12 = por %p169_p8, %p50_p3  ;;  %s652_s13 = sshll.u32 %s880_s26, 4 }
  0x17   : > { %s632_s14 = sshll.u32 %s983_s12, 4  ;;  %s1146_s0 = sld [smem:[#allocation16_spill]] }
  0x18   : > { %s228_s19 = scalar_lea.vmem [#allocation3], %s632_s14  ;;  %p992_p13 = pnand %p677_p10, %p963_p5 }
  0x19   : > { %s237_s20 = sshll.u32 %s228_s19, 4  ;;  %p638_p0 = scmp.ge.s32.totalorder %s880_s26, 1  ;;  %s238_s20 = int_to_ptr.vmem [resolvable:$true] %s237_s20 }
  0x1a   : > { %p262_p1 = scmp.lt.s32.totalorder %s880_s26, 3  ;;  %s635_s22 = sshll.u32 %s983_s12, 3 }
  0x1b   : > { %s225_s27 = scalar_lea.sflag [#allocation4], %s983_s12  ;;  %p722_p3 = pneg %p992_p13 }
  0x1d   : > { %s233_s17 = scalar_lea.hbm %s1146_s0, %s652_s13  ;;  %s725_s14 = scalar_lea.hbm %s1146_s0, 32 }
  0x1e   : > { %s235_s18 = sshll.u32 %s233_s17, 4  ;;  %s236_s18 = int_to_ptr.hbm [resolvable:$true] %s235_s18 }
  0x1f   : > { %s718_s29 = sshra.s32 %s236_s18, 4  ;;  %s719_s29 = int_to_ptr.hbm [resolvable:$true] %s718_s29 }
  0x20   : > { %s720_s30 = scalar_lea.hbm %s719_s29, 16  ;;  %p726_p5 = scmp.lt.s32.totalorder %s719_s29, %s1146_s0 }
  0x21   : > { %p721_p2 = scmp.ne.s32.totalorder %s719_s29, %s720_s30  ;;  %p727_p8 = scmp.lt.s32.totalorder %s725_s14, %s720_s30 }
  0x23   : > { %p723_p4 = pnand %p722_p3, %p721_p2  ;;  %p728_p10 = por %p727_p8, %p726_p5 }
  0x25   : > { %p724_p7 = pneg %p723_p4 }
  0x27   : > { %p729_p9 = pnand %p728_p10, %p724_p7 }
  0x29   : > { %732 = shalt.err (!%p729_p9)
}
  0x2a   : > { %666 = dma.hbm_to_vmem [thread:$0]  (!%p992_p13), %s236_s18, 256, %s238_s20, %s225_s27  }
  0x2b   : > { %p1017_p2 = pnand %p638_p0, %p262_p1  ;;  %s653_s19 = sshll.u32 %s880_s26, 3 }
  0x2c   : > { %s248_s29 = scalar_lea.vmem [#allocation6], %s635_s22  ;;  %s253_s14 = scalar_lea.hbm %s1134_s1, %s653_s19 }
  0x2d   : > { %s257_s30 = sshll.u32 %s248_s29, 4  ;;  %s255_s15 = sshll.u32 %s253_s14, 4  ;;  %s258_s30 = int_to_ptr.vmem [resolvable:$true] %s257_s30  ;;  %s256_s15 = int_to_ptr.hbm [resolvable:$true] %s255_s15 }
  0x2e   : > { %s245_s16 = scalar_lea.sflag [#allocation7], %s983_s12  ;;  %s748_s0 = sshra.s32 %s256_s15, 4  ;;  %s749_s0 = int_to_ptr.hbm [resolvable:$true] %s748_s0 }
  0x2f   : > { %s750_s18 = scalar_lea.hbm %s749_s0, 8  ;;  %s755_s22 = scalar_lea.hbm %s1134_s1, 16 }
  0x30   : > { %p751_p9 = scmp.ne.s32.totalorder %s749_s0, %s750_s18  ;;  %p756_p4 = scmp.lt.s32.totalorder %s749_s0, %s1134_s1 }
  0x31   : > { %p757_p7 = scmp.lt.s32.totalorder %s755_s22, %s750_s18 }
  0x32   : > { %p753_p0 = pnand %p751_p9, %p722_p3 }
  0x33   : > { %p758_p5 = por %p757_p7, %p756_p4 }
  0x34   : > { %p754_p1 = pneg %p753_p0 }
  0x36   : > { %p759_p8 = pnand %p758_p5, %p754_p1 }
  0x38   : > { %762 = shalt.err (!%p759_p8)
}
  0x39   : > { %669 = dma.hbm_to_vmem [thread:$0]  (!%p992_p13), %s256_s15, 128, %s258_s30, %s245_s16  }
  0x3a   : > { %266 = sbr.rel (%p1017_p2) target bundleno = 616 (0x268), region = 40  ;;  %s1040_s12 = sand.u32 (!%p1017_p2), 1, %s872_s24  }
  0x3b   : > { %s639_s19 = sshll.u32 (!%p1017_p2), %s1040_s12, 4  ;;  %s269_s7 = scalar_lea.sflag (!%p1017_p2), [#allocation4], %s1040_s12 }
  0x3c   : > { %s272_s0 = scalar_lea.vmem (!%p1017_p2), [#allocation3], %s639_s19 }
  0x3f   : > { %851 = dma.done.wait (%p967_p6), %s269_s7, 256  }
  0x40   : > { %853 = vsyncadd (%p967_p6), %s269_s7, 4294967040  ;;  %s640_s21 = sshll.u32 %s1040_s12, 3  ;;  %s279_s17 = scalar_lea.sflag [#allocation7], %s1040_s12 }
  0x41   : > { %s282_s30 = scalar_lea.vmem [#allocation6], %s640_s21 }
  0x42   : > { %855 = dma.done.wait (%p967_p6), %s279_s17, 128  }
  0x43   : > { %857 = vsyncadd (%p967_p6), %s279_s17, 4294967168  ;;  %v882_v0 = vmov 0   ;;  %vm334_vm0 = vcmask 64512   ;;  %v1056_v1 = vld [vmem:[%s272_s0] sm:$0xff]  ;;  %v1058_v2 = vld [vmem:[%s272_s0 + $0x8] sm:$0xff]  ;;  %vm387_vm1 = vcmask 1043456   ;;  %v411_v36 = vlaneseq }
  0x44   : > { %715 = vset.pattern.permute.xlu0 %v882_v0  ;;  %v322_v3 = vld [vmem:[%s1135_s2] sm:$0xf]  ;;  %353 = vmatpush.msra.mxu0 %v1056_v1  ;;  %v327_v5 = vld [vmem:[%s282_s30] sm:$0xff]  ;;  %s324_s9 = sld [smem:[#allocation2]]  ;;  %s883_s16 = smov 16   ;;  %vm459_vm8 = vcmask 1040384  }
  0x45   : > { %373 = vmatpush.msra.mxu1 %v1058_v2  ;;  %v323_v4 = vld [vmem:[%s1136_s3] sm:$0xf]  ;;  %643 = vmatmul.msk.f32.vlgmr.msra.gmra.mxu0 %vm334_vm0, %v322_v3  ;;  %329 = vst [vmem:[#allocation1] ss:$2 sm:$0xff] %v327_v5  ;;  %v412_v37 = vand.u32 127, %v411_v36  ;;  %s884_s18 = smov 32  }
  0x46   : > { %644 = vmatmul.msk.f32.vlgmr.msra.gmra.mxu1 %vm334_vm0, %v322_v3  ;;  %382 = vperm.xlu0 %715, %v323_v4   ;;  %s885_s20 = smov 64   ;;  %s642_s27 = sshll.u32 %s1040_s12, 1  ;;  %vm464_vm9 = vcmp.lt.s32.totalorder %v411_v36, 256 }
  0x47   : > { %vm413_vm2 = vcmp.lt.s32.totalorder %v412_v37, 16  ;;  %vm422_vm3 = vcmp.lt.s32.totalorder %v412_v37, 32  ;;  %vm431_vm4 = vcmp.lt.s32.totalorder %v412_v37, 64  ;;  %s649_s22 = sshll.u32 %s945_s4, 1  ;;  %s654_s29 = sshll.u32 %s945_s4, 4 }
  0x48   : > { %s498_s21 = scalar_lea.hbm %s1139_s6, %s649_s22  ;;  %s484_s8 = scalar_lea.hbm %s1138_s5, %s654_s29 }
  0x49   : > { %s321_s13 = scalar_lea.vmem [#allocation9], %s642_s27  ;;  %s502_s15 = sshll.u32 %s498_s21, 4  ;;  %s503_s15 = int_to_ptr.hbm [resolvable:$true] %s502_s15 }
  0x4a   : > { %v402_v29 = vstv %s324_s9  ;;  %s500_s14 = sshll.u32 %s321_s13, 4  ;;  %s1079_s9 = scalar_lea.vmem [#allocation8], %s639_s19  ;;  %s501_s14 = int_to_ptr.vmem [resolvable:$true] %s500_s14 }
  0x4b   : > { %s486_s4 = sshll.u32 %s1079_s9, 4  ;;  %s473_s19 = scalar_lea.sflag [#allocation10], %s1040_s12  ;;  %s1084_s4 = int_to_ptr.vmem [resolvable:$true] %s486_s4 }
  0x4c   : > { %v330_v6 = vld.sshfl [vmem:[#allocation1] sm:$0xff pattern:$0x75316420]  ;;  %v331_v7 = vld.sshfl [vmem:[#allocation1 + $0x8] sm:$0xff pattern:$0x75316420] }
  0x4d   : > { %s798_s29 = scalar_lea.hbm %s1139_s6, 4 }
  0xb8   : > { %v383_v12 = vpop.permute.xlu0 %382 }
  0xc2   : > { %v355_v8 = vpop.f32.mrf.mxu0 }
  0xc3   : > { %v375_v9 = vpop.f32.mrf.mxu1  ;;  %v356_v10 = vadd.f32 %v355_v8, %v330_v6 }
  0xc4   : > { %v376_v11 = vadd.f32 %v375_v9, %v331_v7 }
  0xc5   : > { %v378_v13 = vmax.f32 %v356_v10, 0.0 }
  0xc6   : > { %v379_v14 = vmax.f32 %v376_v11, 0.0 }
  0xc7   : > { %v385_v15 = vmul.f32 %v383_v12, %v378_v13 }
  0xc8   : > { %v386_v16 = vmul.f32 %v383_v12, %v379_v14 }
  0xc9   : > { %v388_v17 = vsel %vm387_vm1, %v385_v15, 0.0 }
  0xca   : > { %v395_v18 = vsel %vm387_vm1, %v386_v16, 0.0  ;;  %v389_v19 = vrot.slane %v388_v17, 4 }
  0xcb   : > { %v396_v20 = vrot.slane %v395_v18, 4 }
  0xcc   : > { %v390_v21 = vadd.f32 %v389_v19, %v388_v17 }
  0xcd   : > { %v397_v22 = vadd.f32 %v396_v20, %v395_v18 }
  0xce   : > { %v391_v23 = vrot.slane %v390_v21, 2 }
  0xcf   : > { %v398_v24 = vrot.slane %v397_v22, 2 }
  0xd0   : > { %v392_v25 = vadd.f32 %v391_v23, %v390_v21 }
  0xd1   : > { %v399_v26 = vadd.f32 %v398_v24, %v397_v22 }
  0xd2   : > { %v393_v27 = vrot.slane %v392_v25, 1 }
  0xd3   : > { %v400_v28 = vrot.slane %v399_v26, 1 }
  0xd4   : > { %v394_v31 = vadd.f32 %v393_v27, %v392_v25 }
  0xd5   : > { %v401_v30 = vadd.f32 %v400_v28, %v399_v26 }
  0xd6   : > { %v403_v33 = vadd.f32 %v402_v29, %v394_v31 }
  0xd7   : > { %v404_v32 = vadd.f32 %v402_v29, %v401_v30 }
  0xd8   : > { %v405_v35 = vmul.f32 %v403_v33, %v403_v33 }
  0xd9   : > { %v406_v34 = vmul.f32 %v404_v32, %v404_v32 }
  0xda   : > { %407 = vrot.lane.b32.xlu0 %v405_v35, %s883_s16 }
  0xdb   : > { %409 = vrot.lane.b32.xlu1 %v406_v34, %s883_s16  ;;  %s488_s16 = sshll.u32 %s484_s8, 4  ;;  %s1086_s16 = int_to_ptr.hbm [resolvable:$true] %s488_s16 }
 0x14c   : > { %v408_v39 = vpop.permute.xlu0 %407 }
 0x14d   : > { %v410_v38 = vpop.permute.xlu1 %409 }
 0x14e   : > { %v414_v40 = vsel %vm413_vm2, %v408_v39, %v410_v38  ;;  %v415_v41 = vsel %vm413_vm2, %v410_v38, %v408_v39 }
 0x14f   : > { %v416_v42 = vadd.f32 %v415_v41, %v405_v35  ;;  %v417_v43 = vadd.f32 %v414_v40, %v406_v34 }
 0x151   : > { %418 = vrot.lane.b32.xlu1 %v416_v42, %s884_s18  ;;  %420 = vrot.lane.b32.xlu2 %v417_v43, %s884_s18  ;;  %s792_s18 = sshra.s32 %s503_s15, 4  ;;  %s793_s18 = int_to_ptr.hbm [resolvable:$true] %s792_s18 }
 0x152   : > { %p799_p10 = scmp.lt.s32.totalorder %s793_s18, %s1139_s6 }
 0x1ab   : > { %v421_v44 = vpop.permute.xlu2 %420 }
 0x1c3   : > { %v419_v45 = vpop.permute.xlu1 %418 }
 0x1c4   : > { %v423_v46 = vsel %vm422_vm3, %v419_v45, %v421_v44  ;;  %v424_v47 = vsel %vm422_vm3, %v421_v44, %v419_v45 }
 0x1c5   : > { %v425_v48 = vadd.f32 %v424_v47, %v416_v42  ;;  %v426_v49 = vadd.f32 %v423_v46, %v417_v43 }
 0x1c7   : > { %427 = vrot.lane.b32.xlu2 %v425_v48, %s885_s20  ;;  %429 = vrot.lane.b32.xlu0 %v426_v49, %s885_s20  ;;  %s794_s20 = scalar_lea.hbm %s793_s18, 2 }
 0x1c8   : > { %p795_p6 = scmp.ne.s32.totalorder %s793_s18, %s794_s20  ;;  %p800_p2 = scmp.lt.s32.totalorder %s798_s29, %s794_s20 }
 0x1ca   : > { %p796_p13 = pnand %p795_p6, %p974_p11  ;;  %p801_p9 = por %p800_p2, %p799_p10 }
 0x1cc   : > { %p797_p3 = pneg %p796_p13 }
 0x1ce   : > { %p802_p0 = pnand %p801_p9, %p797_p3 }
 0x221   : > { %v428_v50 = vpop.permute.xlu2 %427 }
 0x239   : > { %v430_v51 = vpop.permute.xlu0 %429 }
 0x23a   : > { %v432_v52 = vsel %vm431_vm4, %v428_v50, %v430_v51  ;;  %v433_v53 = vsel %vm431_vm4, %v430_v51, %v428_v50 }
 0x23b   : > { %v434_v54 = vadd.f32 %v433_v53, %v425_v48  ;;  %v435_v55 = vadd.f32 %v432_v52, %v426_v49 }
 0x23d   : > { %v436_v56 = vadd.f32 %v435_v55, %v434_v54 }
 0x23f   : > { %v437_v57 = vmax.f32 %v436_v56, 1e-24 }
 0x241   : > { %716 = vrsqrt.f32 %v437_v57  ;;  %vm444_vm6 = vweird.f32 %v437_v57 }
 0x247   : > { %v717_v58 = vpop.eup %716 }
 0x248   : > { %v439_v59 = vmul.f32 %v717_v58, %v437_v57  ;;  %vm445_vm5 = vweird.f32 %v717_v58 }
 0x249   : > { %vm446_vm7 = vmor %vm444_vm6, %vm445_vm5 }
 0x24a   : > { %v440_v60 = vmul.f32 %v717_v58, %v439_v59 }
 0x24c   : > { %v441_v61 = vmul.f32 0.5, %v440_v60 }
 0x24e   : > { %v442_v62 = vsub.f32 1.5, %v441_v61 }
 0x250   : > { %v443_v63 = vmul.f32 %v717_v58, %v442_v62 }
 0x252   : > { %v447_v0 = vsel %vm446_vm7, %v717_v58, %v443_v63 }
 0x253   : > { %v448_v3 = vmul.f32 %v447_v0, %v403_v33  ;;  %v449_v4 = vmul.f32 %v447_v0, %v404_v32 }
 0x255   : > { %v450_v5 = vperm.slane %v448_v3, 0  ;;  %v451_v6 = vperm.slane %v449_v4, 0  ;;  %v458_v7 = vrot.slane %v449_v4, 7 }
 0x257   : > { %v452_v8 = vmul.f32 %v450_v5, %v1056_v1  ;;  %v453_v9 = vmul.f32 %v451_v6, %v1058_v2  ;;  %v460_v10 = vsel %vm459_vm8, %v448_v3, %v458_v7 }
 0x258   : > { %466 = vst.msk [vmem:[%s321_s13] sm:$0x3] %vm464_vm9, %v460_v10 }
 0x259   : > { %454 = vst [vmem:[%s1079_s9] sm:$0xff] %v452_v8 }
 0x25a   : > { %805 = shalt.err (!%p802_p0)
}
 0x25b   : > { %660 = dma.vmem_to_hbm [thread:$0]  (%p974_p11), %s501_s14, 32, %s503_s15, %s473_s19   ;;  %455 = vst [vmem:[%s1079_s9 + $0x8] sm:$0xff] %v453_v9 }
 0x25c   : > { %s468_s21 = scalar_lea.sflag [#allocation5], %s1040_s12  ;;  %s820_s17 = sshra.s32 %s1086_s16, 4  ;;  %s821_s17 = int_to_ptr.hbm [resolvable:$true] %s820_s17 }
 0x25d   : > { %s822_s30 = scalar_lea.hbm %s821_s17, 16  ;;  %s826_s18 = scalar_lea.hbm %s1138_s5, 32 }
 0x25e   : > { %p823_p1 = scmp.ne.s32.totalorder %s821_s17, %s822_s30  ;;  %p827_p5 = scmp.lt.s32.totalorder %s821_s17, %s1138_s5 }
 0x25f   : > { %p828_p8 = scmp.lt.s32.totalorder %s826_s18, %s822_s30 }
 0x260   : > { %p824_p4 = pnand %p823_p1, %p974_p11 }
 0x261   : > { %p829_p6 = por %p828_p8, %p827_p5 }
 0x262   : > { %p825_p7 = pneg %p824_p4 }
 0x264   : > { %p830_p13 = pnand %p829_p6, %p825_p7 }
 0x266   : > { %833 = shalt.err (!%p830_p13)
}
 0x267   : > { %659 = dma.vmem_to_hbm [thread:$0]  (%p974_p11), %s1084_s4, 256, %s1086_s16, %s468_s21  }
 0x268 PF: > { %s514_s12 = sand.u32 1, %s868_s23   ;;  %p1149_p3 = scmp.ge.s32.totalorder %s880_s26, 2 }
 0x269   : > { %s515_s14 = scalar_lea.sflag [#allocation5], %s514_s12 }
 0x26a   : > { %p671_p10 = pnand %p1149_p3, %p978_p12 }
 0x26c   : > { %p672_p2 = pneg %p671_p10 }
 0x26e   : > { %859 = dma.done.wait (%p672_p2), %s515_s14, 256  }
 0x26f   : > { %861 = vsyncadd (%p672_p2), %s515_s14, 4294967040  ;;  %s525_s15 = scalar_lea.sflag [#allocation10], %s514_s12 }
 0x270   : > { %863 = dma.done.wait (%p672_p2), %s525_s15, 32  }
 0x271   : > { %865 = vsyncadd (%p672_p2), %s525_s15, 4294967264  ;;  %s1150_s10 = sld [smem:[#allocation15_spill]]  ;;  %p27_p11 = scmp.ge.s32.totalorder %s949_s28, 4  }
 0x272   : > { %s1151_s23 = smov %s872_s24  ;;  %s1152_s24 = smov %s876_s25 }
 0x273   : > { %s1154_s26 = smov %s949_s28  ;;  %29 = sbr.rel (!%p27_p11) target bundleno = 12 (0xc), region = 115 }
 0x277   : > { %s1153_s25 = smov %s1150_s10 }
 0x278   :  { %531 = vsyncpa [#allocation4], 1 }
 0x279   :  { %533 = vsyncpa [#allocation4 + $0x1], 1 }
 0x27a   :  { %534 = vsyncpa [#allocation7], 1 }
 0x27b   :  { %536 = vsyncpa [#allocation7 + $0x1], 1 }
 0x27c   :  { %537 = vsyncpa [#allocation5], 1 }
 0x27d   :  { %539 = vsyncpa [#allocation5 + $0x1], 1 }
 0x27e   :  { %540 = vsyncpa [#allocation10], 1 }
 0x27f   :  { %542 = vsyncpa [#allocation10 + $0x1], 1 }

</bundles_post_ra>
